<compile_context>
chip_gen: v7x
topology: tpu7x:2x2x1
jax: 0.10.0
libtpu: 0.0.40
codegen_flags: <defaults>
</compile_context>

<pallas_src>
import functools

import jax
import jax.numpy as jnp
from jax import lax
from jax.experimental import pallas as pl
from jax.experimental.pallas import tpu as pltpu


def _cls_head_kernel(x_ref, w1_ref, b1_ref, w2_ref, b2_ref, o_ref, *, is_norm):
    """One batch tile; weights stay resident across grid steps.

    x_ref:  [tb, H]   CLS-token features (input dtype, e.g. f32)
    w1_ref: [H, H]    dense weight, pre-transposed to [in, out], bf16
    b1_ref: [1, H]    dense bias, f32
    w2_ref: [H, Lp]   out_proj weight, pre-transposed + zero-padded, bf16
    b2_ref: [1, Lp]   out_proj bias, zero-padded, f32
    o_ref:  [tb, Lp]  logits (lane-padded)
    """
    x = x_ref[...].astype(jnp.float32)

    if is_norm:
        # z_norm over the batch dimension (dim 0), biased variance, eps=1e-9.
        # Only valid because the whole batch is one block in this mode.
        mean = jnp.mean(x, axis=0, keepdims=True)
        ctr = x - mean
        var = jnp.mean(ctr * ctr, axis=0, keepdims=True)
        x = ctr * lax.rsqrt(var + 1e-9)

    # dropout (eval) -> identity
    # dense: x @ W1 (bf16 MXU operands, f32 accumulation) + b1, tanh in f32.
    h = jnp.dot(x.astype(jnp.bfloat16), w1_ref[...],
                preferred_element_type=jnp.float32) + b1_ref[...]
    h = jnp.tanh(h)

    # dropout (eval) -> identity
    # out_proj: h @ W2 + b2 (lane-padded to Lp for an unmasked store).
    logits = jnp.dot(h.astype(jnp.bfloat16), w2_ref[...],
                     preferred_element_type=jnp.float32) + b2_ref[...]

    o_ref[...] = logits.astype(o_ref.dtype)


def roberta_classification_head(features, w_dense, b_dense, w_out, b_out,
                                is_norm, *, batch_tile=256):
    """features: [B, S, H]; weights in PyTorch nn.Linear [out, in] layout.

    Returns logits [B, num_labels].
    """
    B, S, H = features.shape
    L = w_out.shape[0]
    Lp = max(128, pl.cdiv(L, 128) * 128)          # lane-dense out width

    # --- wrapper-side layout plumbing (done once in HBM, cheap) -----------
    w1t = jnp.asarray(w_dense, jnp.float32).T.astype(jnp.bfloat16)   # [H, H]
    b1 = jnp.asarray(b_dense, jnp.float32).reshape(1, H)
    w2t = jnp.asarray(w_out, jnp.float32).T.astype(jnp.bfloat16)     # [H, L]
    w2t = jnp.pad(w2t, ((0, 0), (0, Lp - L)))                        # [H, Lp]
    b2 = jnp.pad(jnp.asarray(b_out, jnp.float32), (0, Lp - L)).reshape(1, Lp)

    # CLS selection: if H is lane-aligned, hand the kernel the (free) [B, S*H]
    # view and let the BlockSpec DMA pull only columns [0:H] (no pre-copy).
    # Otherwise fall back to a strided slice in XLA.
    if H % 128 == 0:
        x_in = features.reshape(B, S * H)
    else:
        x_in = features[:, 0, :]

    # Batch tiling. The batch-axis z-norm needs the full batch in one block.
    if is_norm:
        tb = B
        semantics = ("arbitrary",)
    else:
        tb = min(B, batch_tile)
        semantics = ("parallel",)
    grid = (pl.cdiv(B, tb),)

    kernel = functools.partial(_cls_head_kernel, is_norm=bool(is_norm))

    out = pl.pallas_call(
        kernel,
        out_shape=jax.ShapeDtypeStruct((B, Lp), features.dtype),
        grid_spec=pltpu.PrefetchScalarGridSpec(
            num_scalar_prefetch=0,
            grid=grid,
            in_specs=[
                pl.BlockSpec((tb, H), lambda i: (i, 0)),    # CLS activations
                pl.BlockSpec((H, H), lambda i: (0, 0)),     # W1^T (resident)
                pl.BlockSpec((1, H), lambda i: (0, 0)),     # b1
                pl.BlockSpec((H, Lp), lambda i: (0, 0)),    # W2^T (padded)
                pl.BlockSpec((1, Lp), lambda i: (0, 0)),    # b2 (padded)
            ],
            out_specs=pl.BlockSpec((tb, Lp), lambda i: (i, 0)),
        ),
        compiler_params=pltpu.CompilerParams(
            dimension_semantics=semantics),
    )(x_in, w1t, b1, w2t, b2)

    # Drop the zero-padded label columns before anything downstream sees them.
    return out[:, :L]


def _reference(features, w_dense, b_dense, w_out, b_out, is_norm):
    x = features[:, 0, :]
    if is_norm:
        mean = x.mean(0, keepdims=True)
        var = ((x - mean) ** 2).mean(0, keepdims=True)
        x = (x - mean) / jnp.sqrt(var + 1e-9)
    x = jnp.tanh(x @ w_dense.T + b_dense)
    return x @ w_out.T + b_out


if __name__ == "__main__":
    key = jax.random.PRNGKey(0)
    k_feat, k_w1, k_b1, k_w2, k_b2 = jax.random.split(key, 5)

    # config: hidden_size=128 (lane-aligned), num_labels=4; small batch/seq.
    B, S, H, L = 2, 8, 128, 4

    features = jax.random.normal(k_feat, (B, S, H), dtype=jnp.float32)
    w_dense = jax.random.normal(k_w1, (H, H), dtype=jnp.float32) * 0.05
    b_dense = jax.random.normal(k_b1, (H,), dtype=jnp.float32) * 0.05
    w_out = jax.random.normal(k_w2, (L, H), dtype=jnp.float32) * 0.05
    b_out = jax.random.normal(k_b2, (L,), dtype=jnp.float32) * 0.05

    for is_norm in (True, False):
        out = roberta_classification_head(
            features, w_dense, b_dense, w_out, b_out, is_norm)
        out = jax.block_until_ready(out)
        ref = _reference(features, w_dense, b_dense, w_out, b_out, is_norm)
        assert out.shape == (B, L)
        # bf16 MXU operands -> ~1e-3-level error vs the all-f32 reference.
        assert jnp.allclose(out, ref, atol=2e-2, rtol=2e-2), (
            f"mismatch (is_norm={is_norm}): max err "
            f"{jnp.max(jnp.abs(out - ref))}")

    print("KERNEL_OK")
</pallas_src>

<mosaic_0001>
module attributes {stable_mosaic.version = 11 : i64} {
  func.func @_cls_head_kernel(%arg0: i32, %arg1: memref<2x128xf32, #tpu.memory_space<vmem>>, %arg2: memref<128x128xbf16, #tpu.memory_space<vmem>>, %arg3: memref<1x128xf32, #tpu.memory_space<vmem>>, %arg4: memref<128x128xbf16, #tpu.memory_space<vmem>>, %arg5: memref<1x128xf32, #tpu.memory_space<vmem>>, %arg6: memref<2x128xf32, #tpu.memory_space<vmem>>) attributes {dimension_semantics = [#tpu.dimension_semantics<arbitrary>], iteration_bounds = array<i64: 1>, scalar_prefetch = 0 : i64, scratch_operands = 0 : i64, tpu.core_type = #tpu.core_type<tc>, window_params = [{transform_indices = @transform_0, window_bounds = array<i64: 2, 128>}, {pipeline_mode = #tpu.pipeline_mode<synchronous>, transform_indices = @transform_1, window_bounds = array<i64: 128, 128>}, {pipeline_mode = #tpu.pipeline_mode<synchronous>, transform_indices = @transform_2, window_bounds = array<i64: 1, 128>}, {pipeline_mode = #tpu.pipeline_mode<synchronous>, transform_indices = @transform_3, window_bounds = array<i64: 128, 128>}, {pipeline_mode = #tpu.pipeline_mode<synchronous>, transform_indices = @transform_4, window_bounds = array<i64: 1, 128>}, {transform_indices = @transform_5, window_bounds = array<i64: 2, 128>}]} {
    %c0 = arith.constant 0 : index
    %c0_0 = arith.constant 0 : index
    %0 = vector.load %arg1[%c0, %c0_0] : memref<2x128xf32, #tpu.memory_space<vmem>>, vector<2x128xf32>
    %cst = arith.constant dense<0.000000e+00> : vector<128xf32>
    %1 = vector.multi_reduction <add>, %0, %cst [0] : vector<2x128xf32> to vector<128xf32>
    %2 = vector.shape_cast %1 : vector<128xf32> to vector<1x128xf32>
    %cst_1 = arith.constant 2.000000e+00 : f32
    %3 = vector.broadcast %cst_1 : f32 to vector<1x128xf32>
    %4 = arith.divf %2, %3 : vector<1x128xf32>
    %5 = vector.broadcast %4 : vector<1x128xf32> to vector<2x128xf32>
    %6 = arith.subf %0, %5 : vector<2x128xf32>
    %7 = arith.mulf %6, %6 : vector<2x128xf32>
    %cst_2 = arith.constant dense<0.000000e+00> : vector<128xf32>
    %8 = vector.multi_reduction <add>, %7, %cst_2 [0] : vector<2x128xf32> to vector<128xf32>
    %9 = vector.shape_cast %8 : vector<128xf32> to vector<1x128xf32>
    %cst_3 = arith.constant 2.000000e+00 : f32
    %10 = vector.broadcast %cst_3 : f32 to vector<1x128xf32>
    %11 = arith.divf %9, %10 : vector<1x128xf32>
    %cst_4 = arith.constant 9.99999971E-10 : f32
    %12 = vector.broadcast %cst_4 : f32 to vector<1x128xf32>
    %13 = arith.addf %11, %12 : vector<1x128xf32>
    %14 = math.rsqrt %13 : vector<1x128xf32>
    %15 = vector.broadcast %14 : vector<1x128xf32> to vector<2x128xf32>
    %16 = arith.mulf %6, %15 : vector<2x128xf32>
    %17 = arith.truncf %16 : vector<2x128xf32> to vector<2x128xbf16>
    %c0_5 = arith.constant 0 : index
    %c0_6 = arith.constant 0 : index
    %18 = vector.load %arg2[%c0_5, %c0_6] : memref<128x128xbf16, #tpu.memory_space<vmem>>, vector<128x128xbf16>
    %cst_7 = arith.constant dense<0.000000e+00> : vector<2x128xf32>
    %19 = tpu.matmul %17, %18, %cst_7 {dimension_numbers = #tpu.dot_dimension_numbers<[1], [0], [0], [1], [0, 0, 1, 1], [], []>} : vector<2x128xbf16>, vector<128x128xbf16>, vector<2x128xf32> -> vector<2x128xf32>
    %c0_8 = arith.constant 0 : index
    %c0_9 = arith.constant 0 : index
    %20 = vector.load %arg3[%c0_8, %c0_9] : memref<1x128xf32, #tpu.memory_space<vmem>>, vector<1x128xf32>
    %21 = vector.broadcast %20 : vector<1x128xf32> to vector<2x128xf32>
    %22 = arith.addf %19, %21 : vector<2x128xf32>
    %23 = math.tanh %22 : vector<2x128xf32>
    %24 = arith.truncf %23 : vector<2x128xf32> to vector<2x128xbf16>
    %c0_10 = arith.constant 0 : index
    %c0_11 = arith.constant 0 : index
    %25 = vector.load %arg4[%c0_10, %c0_11] : memref<128x128xbf16, #tpu.memory_space<vmem>>, vector<128x128xbf16>
    %cst_12 = arith.constant dense<0.000000e+00> : vector<2x128xf32>
    %26 = tpu.matmul %24, %25, %cst_12 {dimension_numbers = #tpu.dot_dimension_numbers<[1], [0], [0], [1], [0, 0, 1, 1], [], []>} : vector<2x128xbf16>, vector<128x128xbf16>, vector<2x128xf32> -> vector<2x128xf32>
    %c0_13 = arith.constant 0 : index
    %c0_14 = arith.constant 0 : index
    %27 = vector.load %arg5[%c0_13, %c0_14] : memref<1x128xf32, #tpu.memory_space<vmem>>, vector<1x128xf32>
    %28 = vector.broadcast %27 : vector<1x128xf32> to vector<2x128xf32>
    %29 = arith.addf %26, %28 : vector<2x128xf32>
    %c0_15 = arith.constant 0 : index
    %c0_16 = arith.constant 0 : index
    %30 = vector.load %arg6[%c0_15, %c0_16] : memref<2x128xf32, #tpu.memory_space<vmem>>, vector<2x128xf32>
    tpu.vector_store %arg6[%c0_15, %c0_16], %29 {strides = array<i32>} : memref<2x128xf32, #tpu.memory_space<vmem>>, vector<2x128xf32>,
    return
  }
  func.func @transform_0(%arg0: i32) -> (i32, i32) {
    %c0_i32 = arith.constant 0 : i32
    %c0_i32_0 = arith.constant 0 : i32
    return %arg0, %c0_i32 : i32, i32
  }
  func.func @transform_1(%arg0: i32) -> (i32, i32) {
    %c0_i32 = arith.constant 0 : i32
    %c0_i32_0 = arith.constant 0 : i32
    %c0_i32_1 = arith.constant 0 : i32
    return %c0_i32, %c0_i32_0 : i32, i32
  }
  func.func @transform_2(%arg0: i32) -> (i32, i32) {
    %c0_i32 = arith.constant 0 : i32
    %c0_i32_0 = arith.constant 0 : i32
    %c0_i32_1 = arith.constant 0 : i32
    return %c0_i32, %c0_i32_0 : i32, i32
  }
  func.func @transform_3(%arg0: i32) -> (i32, i32) {
    %c0_i32 = arith.constant 0 : i32
    %c0_i32_0 = arith.constant 0 : i32
    %c0_i32_1 = arith.constant 0 : i32
    return %c0_i32, %c0_i32_0 : i32, i32
  }
  func.func @transform_4(%arg0: i32) -> (i32, i32) {
    %c0_i32 = arith.constant 0 : i32
    %c0_i32_0 = arith.constant 0 : i32
    %c0_i32_1 = arith.constant 0 : i32
    return %c0_i32, %c0_i32_0 : i32, i32
  }
  func.func @transform_5(%arg0: i32) -> (i32, i32) {
    %c0_i32 = arith.constant 0 : i32
    %c0_i32_0 = arith.constant 0 : i32
    return %arg0, %c0_i32 : i32, i32
  }
}

</mosaic_0001>

<bundles_post_ra>
// kernel: tpu_custom_call.1
= control target key start
LH: loop header
LB: loop body
LE: loop exit
PB: predicated region body
PF: predicated region fallthrough
CT: control target
= control target key end

     0   :  { %10 = vsyncpa [#allocation3], 0  ;;  %s646_s0 = inlined_call_operand.hbm [shape: f32[2,1024], index: 0, kind: input, shape index: {}]   ;;  %s647_s1 = inlined_call_operand.hbm [shape: bf16[128,128], index: 1, kind: input, shape index: {}]   ;;  %s648_s2 = inlined_call_operand.vmem [shape: f32[1,128], index: 2, kind: input, shape index: {}]   ;;  %s649_s3 = inlined_call_operand.hbm [shape: bf16[128,128], index: 3, kind: input, shape index: {}]   ;;  %s650_s4 = inlined_call_operand.vmem [shape: f32[1,128], index: 4, kind: input, shape index: {}]   ;;  %s651_s5 = inlined_call_operand.hbm [shape: f32[2,128], index: 5, kind: output, shape index: {}]  }
   0x1   :  { %11 = vsyncpa [#allocation6], 0 }
   0x2   :  { %12 = vsyncpa [#allocation4], 0  ;;  %s525_s18 = smov [#allocation5]   ;;  %s431_s22 = scalar_lea.hbm %s647_s1, 1024 }
   0x3   :  { %s28_s19 = sshll.u32 %s525_s18, 4  ;;  %p432_p0 = scmp.ne.s32.totalorder %s647_s1, %s431_s22  ;;  %s29_s19 = int_to_ptr.vmem [resolvable:$true] %s28_s19 }
   0x4   :  { %p435_p1 = scmp.lt.u32.totalorder %s431_s22, %s647_s1 }
   0x6   :  { %p437_p2 = pnand %p435_p1, %p432_p0 }
   0x8   :  { %440 = shalt.err (!%p437_p2)
}
   0x9   :  { %s441_s27 = scalar_lea.vmem %s29_s19, 1024  ;;  %p446_p4 = scmp.lt.s32.totalorder %s29_s19, %s29_s19 }
   0xa   :  { %p442_p3 = scmp.ne.s32.totalorder %s29_s19, %s441_s27  ;;  %p447_p5 = scmp.lt.s32.totalorder %s441_s27, %s441_s27 }
   0xc   :  { %p448_p6 = por %p447_p5, %p446_p4 }
   0xe   :  { %p449_p7 = pnand %p448_p6, %p442_p3 }
  0x10   :  { %452 = shalt.err (!%p449_p7)
}
  0x11   :  { %s526_s28 = smov 64   ;;  %s527_s29 = smov 4  }
  0x12   :  { %34 = dma.hbm_to_vmem [thread:$0]  %s647_s1, 1024, %s29_s19, [#allocation6], %s526_s28, %s526_s28, %s527_s29  }
  0x13   :  { %s528_s7 = smov [#allocation2]   ;;  %s529_s9 = smov [#allocation7]  }
  0x14   :  { %s19_s8 = sshll.u32 %s528_s7, 4  ;;  %s42_s10 = sshll.u32 %s529_s9, 4  ;;  %s20_s8 = int_to_ptr.vmem [resolvable:$true] %s19_s8  ;;  %s43_s10 = int_to_ptr.vmem [resolvable:$true] %s42_s10 }
  0x15   :  { %s453_s13 = scalar_lea.hbm %s646_s0, 32  ;;  %s455_s18 = scalar_lea.hbm %s646_s0, 256 }
  0x16   :  { %p454_p8 = scmp.ne.s32.totalorder %s646_s0, %s453_s13  ;;  %p456_p9 = scmp.lt.u32.totalorder %s455_s18, %s453_s13 }
  0x17   :  { %p457_p10 = scmp.lt.u32.totalorder %s453_s13, %s646_s0 }
  0x19   :  { %p458_p11 = por %p457_p10, %p456_p9 }
  0x1b   :  { %p459_p12 = pnand %p458_p11, %p454_p8 }
  0x1d   :  { %462 = shalt.err (!%p459_p12)
}
  0x1e   :  { %s463_s19 = scalar_lea.vmem %s20_s8, 32  ;;  %p468_p0 = scmp.lt.s32.totalorder %s20_s8, %s20_s8 }
  0x1f   :  { %p464_p13 = scmp.ne.s32.totalorder %s20_s8, %s463_s19  ;;  %p469_p1 = scmp.lt.s32.totalorder %s463_s19, %s463_s19 }
  0x21   :  { %p470_p2 = por %p469_p1, %p468_p0 }
  0x23   :  { %p471_p3 = pnand %p470_p2, %p464_p13 }
  0x25   :  { %474 = shalt.err (!%p471_p3)
}
  0x26   :  { %22 = dma.hbm_to_vmem [thread:$0]  %s646_s0, 32, %s20_s8, [#allocation3]  }
  0x27   :  { %s475_s25 = scalar_lea.hbm %s649_s3, 1024 }
  0x28   :  { %p476_p4 = scmp.ne.s32.totalorder %s649_s3, %s475_s25  ;;  %p479_p5 = scmp.lt.u32.totalorder %s475_s25, %s649_s3 }
  0x2a   :  { %p481_p6 = pnand %p479_p5, %p476_p4 }
  0x2c   :  { %484 = shalt.err (!%p481_p6)
}
  0x2d   :  { %s485_s7 = scalar_lea.vmem %s43_s10, 1024  ;;  %p490_p8 = scmp.lt.s32.totalorder %s43_s10, %s43_s10 }
  0x2e   :  { %p486_p7 = scmp.ne.s32.totalorder %s43_s10, %s485_s7  ;;  %p491_p9 = scmp.lt.s32.totalorder %s485_s7, %s485_s7 }
  0x30   :  { %p492_p10 = por %p491_p9, %p490_p8 }
  0x32   :  { %p493_p11 = pnand %p492_p10, %p486_p7 }
  0x34   :  { %496 = shalt.err (!%p493_p11)
}
  0x35   :  { %48 = dma.hbm_to_vmem [thread:$0]  %s649_s3, 1024, %s43_s10, [#allocation6], %s526_s28, %s526_s28, %s527_s29  }
  0x36   :  { %519 = dma.done.wait [#allocation3], 32  }
  0x37   :  { %520 = vsyncadd [#allocation3], 4294967264 }
  0x38   :  { %521 = dma.done.wait [#allocation6], 2048  }
  0x39   :  { %522 = vsyncadd [#allocation6], 4294965248  ;;  %v530_v0 = vmov 0.0   ;;  %vm531_vm0 = vmmov 0   ;;  %v411_v1 = vld [vmem:[#allocation5] sm:$0xff]   ;;  %v412_v2 = vld [vmem:[#allocation5 + $0x8] sm:$0xff]  }
  0x3a   :  { %363 = vmatprep.subr.bf16.mxu0 %v530_v0  ;;  %379 = vmatprep.mubr.msk.bf16.mxu0 %vm531_vm0, %v530_v0  ;;  %v413_v3 = vld [vmem:[#allocation5 + $0x10] sm:$0xff]   ;;  %vm62_vm1 = vcmask 1041408   ;;  %v61_v4 = vld [vmem:[#allocation2] sm:$0x3]  ;;  %v419_v6 = vld [vmem:[#allocation7] sm:$0xff]   ;;  %s532_s10 = smov [#allocation8]  }
  0x3b   :  { %383 = vmatprep.subr.bf16.mxu1 %v530_v0  ;;  %399 = vmatprep.mubr.msk.bf16.mxu1 %vm531_vm0, %v530_v0  ;;  %v63_v5 = vsel %vm62_vm1, %v61_v4, 0.0  ;;  %v414_v7 = vld [vmem:[#allocation5 + $0x18] sm:$0xff]   ;;  %v420_v9 = vld [vmem:[#allocation7 + $0x8] sm:$0xff]   ;;  %v415_v11 = vld [vmem:[#allocation5 + $0x20] sm:$0xff]   ;;  %s317_s11 = sshll.u32 %s532_s10, 4  ;;  %s318_s11 = int_to_ptr.vmem [resolvable:$true] %s317_s11 }
  0x3c   :  { %364 = vmatpush3.bf16.msra.mxu0 %v411_v1  ;;  %v64_v8 = vrot.slane %v63_v5, 4  ;;  %384 = vmatpush3.bf16.msra.mxu1 %v419_v6  ;;  %v421_v13 = vld [vmem:[#allocation7 + $0x10] sm:$0xff]   ;;  %v416_v15 = vld [vmem:[#allocation5 + $0x28] sm:$0xff]   ;;  %v422_v17 = vld [vmem:[#allocation7 + $0x18] sm:$0xff]   ;;  %p502_p13 = scmp.lt.s32.totalorder %s318_s11, %s318_s11 }
  0x3d   :  { %365 = vmatprep.subr.bf16.mxu0 %v530_v0  ;;  %385 = vmatprep.subr.bf16.mxu1 %v530_v0  ;;  %v417_v19 = vld [vmem:[#allocation5 + $0x30] sm:$0xff]   ;;  %v418_v22 = vld [vmem:[#allocation5 + $0x38] sm:$0xff]   ;;  %v423_v36 = vld [vmem:[#allocation7 + $0x20] sm:$0xff]  }
  0x3e   :  { %v65_v10 = vadd.f32 %v64_v8, %v63_v5  ;;  %v424_v37 = vld [vmem:[#allocation7 + $0x28] sm:$0xff]   ;;  %v425_v38 = vld [vmem:[#allocation7 + $0x30] sm:$0xff]   ;;  %v426_v39 = vld [vmem:[#allocation7 + $0x38] sm:$0xff]  }
  0x3f   :  { %v327_v40 = vld [vmem:[%s648_s2] ss:$0 sm:$0xff]  ;;  %s497_s2 = scalar_lea.vmem %s318_s11, 32 }
  0x40   :  { %366 = vmatpush3.bf16.msra.mxu0 %v412_v2  ;;  %v66_v12 = vrot.slane %v65_v10, 2  ;;  %386 = vmatpush3.bf16.msra.mxu1 %v420_v9  ;;  %v336_v48 = vld [vmem:[%s650_s4] ss:$0 sm:$0xff]  ;;  %p498_p12 = scmp.ne.s32.totalorder %s318_s11, %s497_s2  ;;  %p503_p0 = scmp.lt.s32.totalorder %s497_s2, %s497_s2 }
  0x41   :  { %367 = vmatprep.subr.bf16.mxu0 %v530_v0  ;;  %387 = vmatprep.subr.bf16.mxu1 %v530_v0 }
  0x42   :  { %v67_v14 = vadd.f32 %v66_v12, %v65_v10  ;;  %p504_p1 = por %p503_p0, %p502_p13 }
  0x44   :  { %368 = vmatpush3.bf16.msra.mxu0 %v413_v3  ;;  %v68_v16 = vrot.slane %v67_v14, 1  ;;  %388 = vmatpush3.bf16.msra.mxu1 %v421_v13  ;;  %p505_p2 = pnand %p504_p1, %p498_p12 }
  0x45   :  { %369 = vmatprep.subr.bf16.mxu0 %v530_v0  ;;  %389 = vmatprep.subr.bf16.mxu1 %v530_v0 }
  0x46   :  { %v69_v18 = vadd.f32 %v68_v16, %v67_v14 }
  0x48   :  { %370 = vmatpush3.bf16.msra.mxu0 %v414_v7  ;;  %v71_v20 = vmul.f32 0.5, %v69_v18  ;;  %390 = vmatpush3.bf16.msra.mxu1 %v422_v17 }
  0x49   :  { %371 = vmatprep.subr.bf16.mxu0 %v530_v0  ;;  %391 = vmatprep.subr.bf16.mxu1 %v530_v0 }
  0x4a   :  { %v72_v21 = vsub.f32 %v61_v4, %v71_v20 }
  0x4c   :  { %372 = vmatpush3.bf16.msra.mxu0 %v415_v11  ;;  %v73_v23 = vmul.f32 %v72_v21, %v72_v21  ;;  %392 = vmatpush3.bf16.msra.mxu1 %v423_v36 }
  0x4d   :  { %373 = vmatprep.subr.bf16.mxu0 %v530_v0  ;;  %393 = vmatprep.subr.bf16.mxu1 %v530_v0 }
  0x4e   :  { %v74_v24 = vsel %vm62_vm1, %v73_v23, 0.0 }
  0x4f   :  { %v75_v25 = vrot.slane %v74_v24, 4 }
  0x50   :  { %374 = vmatpush3.bf16.msra.mxu0 %v416_v15  ;;  %394 = vmatpush3.bf16.msra.mxu1 %v424_v37 }
  0x51   :  { %375 = vmatprep.subr.bf16.mxu0 %v530_v0  ;;  %v76_v26 = vadd.f32 %v75_v25, %v74_v24  ;;  %395 = vmatprep.subr.bf16.mxu1 %v530_v0 }
  0x53   :  { %v77_v27 = vrot.slane %v76_v26, 2 }
  0x54   :  { %376 = vmatpush3.bf16.msra.mxu0 %v417_v19  ;;  %396 = vmatpush3.bf16.msra.mxu1 %v425_v38 }
  0x55   :  { %377 = vmatprep.subr.bf16.mxu0 %v530_v0  ;;  %v78_v28 = vadd.f32 %v77_v27, %v76_v26  ;;  %397 = vmatprep.subr.bf16.mxu1 %v530_v0 }
  0x57   :  { %v79_v29 = vrot.slane %v78_v28, 1 }
  0x58   :  { %378 = vmatpush3.bf16.msra.mxu0 %v418_v22  ;;  %398 = vmatpush3.bf16.msra.mxu1 %v426_v39 }
  0x59   :  { %v80_v30 = vadd.f32 %v79_v29, %v78_v28 }
  0x5b   :  { %v81_v31 = vmul.f32 0.5, %v80_v30 }
  0x5d   :  { %v82_v32 = vadd.f32 1e-09, %v81_v31 }
  0x5f   :  { %427 = vrsqrt.f32 %v82_v32 }
  0x69   :  { %v428_v33 = vpop.eup %427 }
  0x6a   :  { %v84_v34 = vmul.f32 %v428_v33, %v72_v21 }
  0x6c   :  { %v85_v35 = vpack.c.bf16 %v84_v34, %v84_v34 }
  0x6e   :  { %380 = vmatmul.mubr.bf16.vlgmr.msra.gmra.mrb[0].mxu0 %v85_v35 }
 0x141   :  { %v191_v41 = vpop.f32.mrb[0].mxu0 }
 0x142   :  { %v192_v42 = vadd.f32 %v327_v40, %v191_v41  ;;  %v381_v43 = vpop.f32.mrb[1].mxu0 }
 0x143   :  { %v194_v44 = vpop.f32.mrb[2].mxu0 }
 0x144   :  { %429 = vtanh.f32 %v192_v42  ;;  %v382_v45 = vpop.f32.mrb[3].mxu0 }
 0x14e   :  { %v430_v46 = vpop.eup %429 }
 0x14f   :  { %v198_v47 = vpack.c.bf16 %v430_v46, %v430_v46 }
 0x151   :  { %400 = vmatmul.mubr.bf16.vlgmr.msra.gmra.mrb[0].mxu1 %v198_v47 }
 0x224   :  { %v304_v49 = vpop.f32.mrb[0].mxu1 }
 0x225   :  { %v305_v50 = vadd.f32 %v336_v48, %v304_v49  ;;  %v401_v51 = vpop.f32.mrb[1].mxu1 }
 0x226   :  { %v307_v52 = vpop.f32.mrb[2].mxu1 }
 0x227   :  { %310 = vst [vmem:[#allocation8] sm:$0x3] %v305_v50  ;;  %v402_v53 = vpop.f32.mrb[3].mxu1 }
 0x228   :  { %508 = shalt.err (!%p505_p2)
}
 0x229   :  { %s509_s4 = scalar_lea.hbm %s651_s5, 32 }
 0x22a   :  { %p510_p3 = scmp.ne.s32.totalorder %s651_s5, %s509_s4  ;;  %p513_p4 = scmp.lt.u32.totalorder %s509_s4, %s651_s5 }
 0x22c   :  { %p515_p5 = pnand %p513_p4, %p510_p3 }
 0x22e   :  { %518 = shalt.err (!%p515_p5)
}
 0x22f   :  { %320 = dma.vmem_to_hbm [thread:$0]  %s318_s11, 32, %s651_s5, [#allocation4]  }
 0x230   :  { %523 = dma.done.wait [#allocation4], 32  }
 0x231   :  { %524 = vsyncadd [#allocation4], 4294967264 }
 0x232   :  { %324 = vsyncpa [#allocation3], 1 }
 0x233   :  { %325 = vsyncpa [#allocation6], 1 }
 0x234   :  { %326 = vsyncpa [#allocation4], 1 }

</bundles_post_ra>
